<compile_context>
chip_gen: v7x
topology: tpu7x:2x2x1
jax: 0.10.0
libtpu: 0.0.40
codegen_flags: <defaults>
</compile_context>

<pallas_src>
import functools

import jax
import jax.numpy as jnp
from jax.experimental import pallas as pl
from jax.experimental.pallas import tpu as pltpu


def rmsnorm_kernel(x_ref, w_ref, o_ref, *, eps, inv_dim):
    # x_ref: (tm, Dp) block in VMEM, w_ref: (1, Dp), o_ref: (tm, Dp)
    x = x_ref[...]
    xf = x.astype(jnp.float32)

    # mean over the *true* feature dim: padded columns are zero so they add
    # nothing to the sum; divide by the real dim (inv_dim is 1/dim static).
    ms = jnp.sum(xf * xf, axis=-1, keepdims=True) * inv_dim
    inv = jax.lax.rsqrt(ms + eps)                        # EUP, free slot

    normed = (xf * inv).astype(x.dtype)                  # .type_as(x) — keep!
    o_ref[...] = normed.astype(o_ref.dtype) * w_ref[...].astype(o_ref.dtype)


def rmsnorm(x, weight, *, eps=1e-6, row_tile=None):
    """x: (..., dim). weight: (dim,) learnable scale (like torch RMSNorm)."""
    dim = weight.shape[-1]
    assert x.shape[-1] == dim
    orig_shape = x.shape
    out_dtype = jnp.promote_types(x.dtype, weight.dtype)

    # Lane-dense feature dim (biggest single measured lever: unmasked vst).
    dim_p = ((dim + 127) // 128) * 128
    x2d = x.reshape(-1, dim)
    w2d = weight.reshape(1, dim)
    if dim_p != dim:
        x2d = jnp.pad(x2d, ((0, 0), (0, dim_p - dim)))
        w2d = jnp.pad(w2d, ((0, 0), (0, dim_p - dim)))
    m = x2d.shape[0]

    x_bytes = x2d.dtype.itemsize
    o_bytes = jnp.dtype(out_dtype).itemsize
    w_bytes = w2d.dtype.itemsize

    if row_tile is None:
        # (a) HBM-roofline knee: ~6 MiB per x tile, using the real itemsize.
        target_x_bytes = 6 * 1024 * 1024
        # (b) VMEM cap: 2x in-tile + 2x out-tile (double buffered) + ~2 f32
        #     full-tile temporaries per element.
        vmem_budget = 22 * 1024 * 1024
        per_elem_vmem = 2 * x_bytes + 2 * o_bytes + 8
        tm_bw = target_x_bytes // max(dim_p * x_bytes, 1)
        tm_vm = vmem_budget // max(dim_p * per_elem_vmem, 1)
        row_tile = min(tm_bw, tm_vm)
        if row_tile >= 32:
            row_tile = (row_tile // 32) * 32      # sublane quantum (f32/bf16/int8)
        elif row_tile >= 8:
            row_tile = (row_tile // 8) * 8
        else:
            row_tile = 8
    tm = m if m <= row_tile else row_tile          # full-extent block always legal
    grid = (pl.cdiv(m, tm),)

    # Explicit scoped-VMEM limit so the roofline-sized tile actually lands
    # (v5e default is only 16 MiB); footprint includes the f32 temporaries.
    footprint = (2 * tm * dim_p * x_bytes + 2 * tm * dim_p * o_bytes
                 + 2 * dim_p * w_bytes + 3 * tm * dim_p * 4)
    vmem_limit = int(min(max(footprint * 1.3, 32 * 1024 * 1024),
                         48 * 1024 * 1024))

    bytes_in = x2d.size * x_bytes + w2d.size * w_bytes
    bytes_out = m * dim_p * o_bytes
    cost = pl.CostEstimate(
        flops=4 * m * dim_p,          # square + reduce-add + scale + weight mul
        transcendentals=m,            # one rsqrt per row
        bytes_accessed=bytes_in + bytes_out,
    )

    out = pl.pallas_call(
        functools.partial(rmsnorm_kernel, eps=eps, inv_dim=1.0 / dim),
        out_shape=jax.ShapeDtypeStruct((m, dim_p), out_dtype),
        grid_spec=pltpu.PrefetchScalarGridSpec(
            num_scalar_prefetch=0,
            grid=grid,
            in_specs=[
                pl.BlockSpec((tm, dim_p), lambda i: (i, 0)),   # x row tile
                pl.BlockSpec((1, dim_p), lambda i: (0, 0)),    # weight, resident
            ],
            out_specs=pl.BlockSpec((tm, dim_p), lambda i: (i, 0)),
        ),
        compiler_params=pltpu.CompilerParams(
            dimension_semantics=("parallel",),   # shard row tiles across TCs (v7x)
            vmem_limit_bytes=vmem_limit,
        ),
        cost_estimate=cost,
    )(x2d, w2d)

    if dim_p != dim:
        out = out[:, :dim]
    return out.reshape(*orig_shape[:-1], dim)


def rmsnorm_ref(x, weight, eps=1e-6):
    xf = x.astype(jnp.float32)
    inv = jax.lax.rsqrt(jnp.mean(xf * xf, axis=-1, keepdims=True) + eps)
    normed = (xf * inv).astype(x.dtype)            # .type_as(x)
    return normed * weight                         # promotes like torch


if __name__ == "__main__":
    key = jax.random.PRNGKey(0)
    k1, k2, k3, k4 = jax.random.split(key, 4)

    # Case 1: lane-dense feature dim, f32.
    batch, seq, dim = 2, 8, 128
    x = jax.random.normal(k1, (batch, seq, dim), dtype=jnp.float32)
    weight = 1.0 + 0.02 * jax.random.normal(k2, (dim,), dtype=jnp.float32)
    out = jax.block_until_ready(rmsnorm(x, weight))
    ref = rmsnorm_ref(x, weight)
    assert out.shape == x.shape
    assert jnp.allclose(out, ref, atol=1e-5, rtol=1e-5)

    # Case 2: non-128-multiple dim + odd row count, bf16 (exercises the
    # lane-padding path and the sum/true-dim mean).
    m2, dim2 = 13, 96
    x2 = jax.random.normal(k3, (m2, dim2), dtype=jnp.float32).astype(jnp.bfloat16)
    w2 = (1.0 + 0.02 * jax.random.normal(k4, (dim2,), dtype=jnp.float32)
          ).astype(jnp.bfloat16)
    out2 = jax.block_until_ready(rmsnorm(x2, w2))
    ref2 = rmsnorm_ref(x2, w2)
    assert out2.shape == x2.shape
    assert jnp.allclose(out2.astype(jnp.float32), ref2.astype(jnp.float32),
                        atol=2e-2, rtol=2e-2)

    print("KERNEL_OK")
</pallas_src>

<mosaic_0001>
module attributes {stable_mosaic.version = 11 : i64} {
  func.func @rmsnorm_kernel(%arg0: i32, %arg1: memref<16x128xf32, #tpu.memory_space<vmem>>, %arg2: memref<1x128xf32, #tpu.memory_space<vmem>>, %arg3: memref<16x128xf32, #tpu.memory_space<vmem>>) attributes {dimension_semantics = [#tpu.dimension_semantics<parallel>], iteration_bounds = array<i64: 1>, scalar_prefetch = 0 : i64, scratch_operands = 0 : i64, tpu.core_type = #tpu.core_type<tc>, window_params = [{transform_indices = @transform_0, window_bounds = array<i64: 16, 128>}, {pipeline_mode = #tpu.pipeline_mode<synchronous>, transform_indices = @transform_1, window_bounds = array<i64: 1, 128>}, {transform_indices = @transform_2, window_bounds = array<i64: 16, 128>}]} {
    %c0 = arith.constant 0 : index
    %c0_0 = arith.constant 0 : index
    %0 = vector.load %arg1[%c0, %c0_0] : memref<16x128xf32, #tpu.memory_space<vmem>>, vector<16x128xf32>
    %1 = arith.mulf %0, %0 : vector<16x128xf32>
    %cst = arith.constant dense<0.000000e+00> : vector<16xf32>
    %2 = vector.multi_reduction <add>, %1, %cst [1] : vector<16x128xf32> to vector<16xf32>
    %3 = vector.shape_cast %2 : vector<16xf32> to vector<16x1xf32>
    %cst_1 = arith.constant 7.812500e-03 : f32
    %4 = vector.broadcast %cst_1 : f32 to vector<16x1xf32>
    %5 = arith.mulf %3, %4 : vector<16x1xf32>
    %cst_2 = arith.constant 9.99999997E-7 : f32
    %6 = vector.broadcast %cst_2 : f32 to vector<16x1xf32>
    %7 = arith.addf %5, %6 : vector<16x1xf32>
    %8 = math.rsqrt %7 : vector<16x1xf32>
    %9 = vector.broadcast %8 : vector<16x1xf32> to vector<16x128xf32>
    %10 = arith.mulf %0, %9 : vector<16x128xf32>
    %c0_3 = arith.constant 0 : index
    %c0_4 = arith.constant 0 : index
    %11 = vector.load %arg2[%c0_3, %c0_4] : memref<1x128xf32, #tpu.memory_space<vmem>>, vector<1x128xf32>
    %12 = vector.broadcast %11 : vector<1x128xf32> to vector<16x128xf32>
    %13 = arith.mulf %10, %12 : vector<16x128xf32>
    %c0_5 = arith.constant 0 : index
    %c0_6 = arith.constant 0 : index
    %14 = vector.load %arg3[%c0_5, %c0_6] : memref<16x128xf32, #tpu.memory_space<vmem>>, vector<16x128xf32>
    tpu.vector_store %arg3[%c0_5, %c0_6], %13 {strides = array<i32>} : memref<16x128xf32, #tpu.memory_space<vmem>>, vector<16x128xf32>,
    return
  }
  func.func @transform_0(%arg0: i32) -> (i32, i32) {
    %c0_i32 = arith.constant 0 : i32
    %c0_i32_0 = arith.constant 0 : i32
    return %arg0, %c0_i32 : i32, i32
  }
  func.func @transform_1(%arg0: i32) -> (i32, i32) {
    %c0_i32 = arith.constant 0 : i32
    %c0_i32_0 = arith.constant 0 : i32
    %c0_i32_1 = arith.constant 0 : i32
    return %c0_i32, %c0_i32_0 : i32, i32
  }
  func.func @transform_2(%arg0: i32) -> (i32, i32) {
    %c0_i32 = arith.constant 0 : i32
    %c0_i32_0 = arith.constant 0 : i32
    return %arg0, %c0_i32 : i32, i32
  }
}

</mosaic_0001>

<bundles_post_ra>
// kernel: tpu_custom_call.1
= control target key start
LH: loop header
LB: loop body
LE: loop exit
PB: predicated region body
PF: predicated region fallthrough
CT: control target
= control target key end

     0   :  { %7 = vsyncpa [#allocation3], 0  ;;  %s179_s0 = inlined_call_operand.hbm [shape: f32[16,128], index: 0, kind: input, shape index: {}]   ;;  %s180_s1 = inlined_call_operand.vmem [shape: f32[1,128], index: 1, kind: input, shape index: {}]   ;;  %s181_s2 = inlined_call_operand.hbm [shape: f32[16,128], index: 2, kind: output, shape index: {}]  }
   0x1   :  { %8 = vsyncpa [#allocation4], 0  ;;  %s127_s9 = smov [#allocation2]   ;;  %s79_s13 = scalar_lea.hbm %s179_s0, 256 }
   0x2   :  { %s14_s10 = sshll.u32 %s127_s9, 4  ;;  %p80_p0 = scmp.ne.s32.totalorder %s179_s0, %s79_s13  ;;  %s15_s10 = int_to_ptr.vmem [resolvable:$true] %s14_s10 }
   0x3   :  { %p83_p1 = scmp.lt.u32.totalorder %s79_s13, %s179_s0 }
   0x5   :  { %p85_p2 = pnand %p83_p1, %p80_p0 }
   0x7   :  { %88 = shalt.err (!%p85_p2)
}
   0x8   :  { %s89_s18 = scalar_lea.vmem %s15_s10, 256  ;;  %p94_p4 = scmp.lt.s32.totalorder %s15_s10, %s15_s10 }
   0x9   :  { %p90_p3 = scmp.ne.s32.totalorder %s15_s10, %s89_s18  ;;  %p95_p5 = scmp.lt.s32.totalorder %s89_s18, %s89_s18 }
   0xb   :  { %p96_p6 = por %p95_p5, %p94_p4 }
   0xd   :  { %p97_p7 = pnand %p96_p6, %p90_p3 }
   0xf   :  { %100 = shalt.err (!%p97_p7)
}
  0x10   :  { %s128_s19 = smov 128   ;;  %s129_s20 = smov 8  }
  0x11   :  { %20 = dma.hbm_to_vmem [thread:$0]  %s179_s0, 256, %s15_s10, [#allocation3], %s128_s19, %s128_s19, %s129_s20  }
  0x12   :  { %123 = dma.done.wait [#allocation3], 256  }
  0x13   :  { %124 = vsyncadd [#allocation3], 4294967040  ;;  %v26_v0 = vld [vmem:[#allocation2] sm:$0xff]  ;;  %v27_v1 = vld [vmem:[#allocation2 + $0x8] sm:$0xff]  ;;  %s130_s0 = smov [#allocation5]  }
  0x14   :  { %v28_v2 = vmul.f32 %v26_v0, %v26_v0  ;;  %v29_v3 = vmul.f32 %v27_v1, %v27_v1  ;;  %v70_v11 = vld [vmem:[%s180_s1] ss:$0 sm:$0xff]  ;;  %s58_s25 = sshll.u32 %s130_s0, 4  ;;  %s59_s25 = int_to_ptr.vmem [resolvable:$true] %s58_s25 }
  0x15   :  { %s101_s26 = scalar_lea.vmem %s59_s25, 256  ;;  %p106_p9 = scmp.lt.s32.totalorder %s59_s25, %s59_s25 }
  0x16   :  { %30 = vadd.xlane.f32.xlu0 %v28_v2  ;;  %p102_p8 = scmp.ne.s32.totalorder %s59_s25, %s101_s26  ;;  %p107_p10 = scmp.lt.s32.totalorder %s101_s26, %s101_s26 }
  0x18   :  { %p108_p11 = por %p107_p10, %p106_p9 }
  0x1a   :  { %32 = vadd.xlane.f32.xlu0 %v29_v3  ;;  %p109_p12 = pnand %p108_p11, %p102_p8 }
  0xa3   :  { %v31_v4 = vpop.xlane.xlu0 %30 }
  0xa4   :  { %v34_v5 = vmul.f32 0.0078125, %v31_v4 }
  0xa6   :  { %v36_v6 = vadd.f32 1e-06, %v34_v5 }
  0xa7   :  { %v33_v7 = vpop.xlane.xlu0 %32 }
  0xa8   :  { %75 = vrsqrt.f32 %v36_v6  ;;  %v35_v8 = vmul.f32 0.0078125, %v33_v7 }
  0xaa   :  { %v37_v9 = vadd.f32 1e-06, %v35_v8 }
  0xac   :  { %77 = vrsqrt.f32 %v37_v9 }
  0xb2   :  { %v76_v10 = vpop.eup %75 }
  0xb3   :  { %v40_v12 = vmul.f32 %v76_v10, %v26_v0 }
  0xb5   :  { %v49_v13 = vmul.f32 %v70_v11, %v40_v12 }
  0xb6   :  { %v78_v14 = vpop.eup %77 }
  0xb7   :  { %v41_v15 = vmul.f32 %v78_v14, %v27_v1  ;;  %51 = vst [vmem:[#allocation5] sm:$0xff] %v49_v13 }
  0xb9   :  { %v50_v16 = vmul.f32 %v70_v11, %v41_v15 }
  0xbb   :  { %52 = vst [vmem:[#allocation5 + $0x8] sm:$0xff] %v50_v16 }
  0xbc   :  { %112 = shalt.err (!%p109_p12)
}
  0xbd   :  { %s113_s1 = scalar_lea.hbm %s181_s2, 256 }
  0xbe   :  { %p114_p13 = scmp.ne.s32.totalorder %s181_s2, %s113_s1  ;;  %p117_p0 = scmp.lt.u32.totalorder %s113_s1, %s181_s2 }
  0xc0   :  { %p119_p1 = pnand %p117_p0, %p114_p13 }
  0xc2   :  { %122 = shalt.err (!%p119_p1)
}
  0xc3   :  { %64 = dma.vmem_to_hbm [thread:$0]  %s59_s25, 256, %s181_s2, [#allocation4], %s128_s19, %s128_s19, %s129_s20  }
  0xc4   :  { %125 = dma.done.wait [#allocation4], 256  }
  0xc5   :  { %126 = vsyncadd [#allocation4], 4294967040 }
  0xc6   :  { %68 = vsyncpa [#allocation3], 1 }
  0xc7   :  { %69 = vsyncpa [#allocation4], 1 }

</bundles_post_ra>
